<compile_context>
chip_gen: v7x
topology: tpu7x:2x2x1
jax: 0.10.0
libtpu: 0.0.40
codegen_flags: <defaults>
</compile_context>

<pallas_src>
import functools
import math

import jax
import jax.numpy as jnp
from jax.experimental import pallas as pl
from jax.experimental.pallas import tpu as pltpu


# ---------------------------------------------------------------------------
# kernels
# ---------------------------------------------------------------------------


def _focal_row_loss(x, t, a, *, gamma, use_alpha):
    """Per-position focal loss for a (C, TS) logits tile (class on sublanes)."""
    c, tsz = x.shape
    m = jnp.max(x, axis=0, keepdims=True)                        # (1, TS)
    z = x - m
    lse = jnp.log(jnp.sum(jnp.exp(z), axis=0, keepdims=True))    # (1, TS)
    cls = jax.lax.broadcasted_iota(jnp.int32, (c, tsz), 0)
    onehot = (cls == t).astype(jnp.float32)                      # (C, TS)
    z_t = jnp.sum(z * onehot, axis=0, keepdims=True)             # gather via one-hot
    logpt = z_t - lse                                            # (1, TS)
    pt = jnp.exp(logpt)
    if use_alpha:
        at = jnp.sum(a * onehot, axis=0, keepdims=True)          # (1, TS)
        logpt = logpt * at
    omp = jnp.maximum(1.0 - pt, 0.0)
    g = float(gamma)
    if g == 0.0:
        w = jnp.ones_like(pt)
    elif g.is_integer() and g > 0:
        w = omp
        for _ in range(int(g) - 1):
            w = w * omp
    else:
        w = jnp.power(omp, g)
    return -w * logpt                                            # (1, TS)


def _focal_nchw_kernel(x_ref, t_ref, *rest, gamma, use_alpha, valid_s,
                       need_mask):
    if use_alpha:
        a_ref, out_ref = rest
        a = a_ref[...]                 # (C, 1), resident; hoisted load
    else:
        (out_ref,) = rest
        a = None

    j = pl.program_id(1)
    nb = x_ref.shape[0]
    tsz = x_ref.shape[2]

    def tile_total(mask_tail):
        total = jnp.zeros((), jnp.float32)
        for b in range(nb):            # static unroll, nb is small (<= 8)
            x = x_ref[b].astype(jnp.float32)     # (C, TS)
            t = t_ref[b]                         # (1, TS) int32
            loss = _focal_row_loss(x, t, a, gamma=gamma, use_alpha=use_alpha)
            if mask_tail:
                col = (jax.lax.broadcasted_iota(jnp.int32, (1, tsz), 1)
                       + j * tsz)
                loss = jnp.where(col < valid_s, loss, 0.0)   # NaN-safe select
            total = total + jnp.sum(loss)
        return total

    lane = jax.lax.broadcasted_iota(jnp.int32, (1, 1, 128), 2)

    def write(total):
        out_ref[...] = jnp.where(lane == 0, total, 0.0)

    if need_mask:
        last = pl.num_programs(1) - 1

        @pl.when(j == last)
        def _():
            write(tile_total(True))

        @pl.when(j != last)
        def _():
            write(tile_total(False))
    else:
        write(tile_total(False))


def _focal_rows_kernel(x_ref, t_ref, *rest, gamma, use_alpha, valid_m,
                       need_mask):
    """(TM, C) tiles: rows on sublanes, classes on lanes (transpose-free 2D)."""
    if use_alpha:
        a_ref, out_ref = rest
    else:
        (out_ref,) = rest

    i = pl.program_id(0)
    tm, c = x_ref.shape

    def tile_total(mask_tail):
        x = x_ref[...].astype(jnp.float32)       # (TM, C)
        t = t_ref[...]                           # (TM, 1) int32
        m = jnp.max(x, axis=1, keepdims=True)
        z = x - m
        lse = jnp.log(jnp.sum(jnp.exp(z), axis=1, keepdims=True))
        cls = jax.lax.broadcasted_iota(jnp.int32, (tm, c), 1)
        onehot = (cls == t).astype(jnp.float32)
        z_t = jnp.sum(z * onehot, axis=1, keepdims=True)
        logpt = z_t - lse                        # (TM, 1)
        pt = jnp.exp(logpt)
        if use_alpha:
            at = jnp.sum(a_ref[...] * onehot, axis=1, keepdims=True)
            logpt = logpt * at
        omp = jnp.maximum(1.0 - pt, 0.0)
        g = float(gamma)
        if g == 0.0:
            w = jnp.ones_like(pt)
        elif g.is_integer() and g > 0:
            w = omp
            for _ in range(int(g) - 1):
                w = w * omp
        else:
            w = jnp.power(omp, g)
        loss = -w * logpt                        # (TM, 1)
        if mask_tail:
            row = jax.lax.broadcasted_iota(jnp.int32, (tm, 1), 0) + i * tm
            loss = jnp.where(row < valid_m, loss, 0.0)
        return jnp.sum(loss)

    lane = jax.lax.broadcasted_iota(jnp.int32, (1, 128), 1)

    def write(total):
        out_ref[...] = jnp.where(lane == 0, total, 0.0)

    if need_mask:
        last = pl.num_programs(0) - 1

        @pl.when(i == last)
        def _():
            write(tile_total(True))

        @pl.when(i != last)
        def _():
            write(tile_total(False))
    else:
        write(tile_total(False))


# ---------------------------------------------------------------------------
# wrappers
# ---------------------------------------------------------------------------


def _vmem_capacity_bytes():
    try:
        info = pltpu.get_tpu_info()
        cap = int(getattr(info, "vmem_capacity_bytes", 0))
        if cap > 0:
            return cap
    except Exception:
        pass
    return 64 << 20                    # conservative default (v7x per-TC VMEM)


def _alpha_array(alpha, c):
    if isinstance(alpha, (float, int)):
        a = jnp.array([float(alpha), 1.0 - float(alpha)], jnp.float32)
    else:
        a = jnp.asarray(alpha, jnp.float32).reshape(-1)
    if a.shape[0] < c:
        # zero-pad: classes >= len(alpha) silently contribute 0 loss
        # (PyTorch's gather would raise -- documented divergence).
        a = jnp.concatenate([a, jnp.zeros((c - a.shape[0],), jnp.float32)])
    return a[:c]


def _focal_loss_nchw(x, target, a, *, gamma, use_alpha, ts=None):
    n, c = x.shape[0], x.shape[1]
    x3 = x.reshape(n, c, -1)                       # free reshape, no transpose
    s = x3.shape[-1]
    t3 = target.reshape(n, 1, s).astype(jnp.int32)

    itemsize = x3.dtype.itemsize
    sub = 8 if itemsize >= 4 else 32 // itemsize   # sublane tile for the dtype
    pad_c = max(sub, ((c + sub - 1) // sub) * sub)
    lane_logit_bytes = pad_c * itemsize
    lane_bytes = lane_logit_bytes + 4              # + int32 target per lane

    vmem_cap = max(_vmem_capacity_bytes(), 32 << 20)
    tile_target = min(max(vmem_cap // 8, 2 << 20), 8 << 20)   # per-buffer logits

    if ts is None:
        ts_max = max(128, tile_target // lane_logit_bytes)
        ts = s if s <= ts_max else max(128, (ts_max // 128) * 128)
    g_s = pl.cdiv(s, ts)
    need_mask = (s % ts) != 0

    # batch-row blocking: amortize per-step overhead on small-S inputs while
    # keeping >=2 outer blocks so both v7x TensorCores get work.
    nb_cap = max(1, tile_target // max(1, lane_logit_bytes * ts))
    nb_limit = max(1, min(nb_cap, n if n < 2 else n // 2, 8))
    nb = max(d for d in range(1, nb_limit + 1) if n % d == 0)
    g_b = n // nb

    kernel = functools.partial(
        _focal_nchw_kernel, gamma=float(gamma), use_alpha=use_alpha,
        valid_s=s, need_mask=need_mask)

    in_specs = [
        pl.BlockSpec((nb, c, ts), lambda i, j: (i, 0, j)),   # logits tile
        pl.BlockSpec((nb, 1, ts), lambda i, j: (i, 0, j)),   # targets tile
    ]
    args = [x3, t3]
    if use_alpha:
        in_specs.append(pl.BlockSpec((c, 1), lambda i, j: (0, 0)))  # resident
        args.append(a.reshape(c, 1))

    block_bytes = nb * ts * lane_bytes
    working = 2 * block_bytes + pad_c * 128 * 4 + 2 * 128 * 4
    vmem_limit = int(min(max(working + (4 << 20), 8 << 20),
                         vmem_cap - (4 << 20)))

    part = pl.pallas_call(
        kernel,
        out_shape=jax.ShapeDtypeStruct((g_b, 1, g_s * 128), jnp.float32),
        grid_spec=pltpu.PrefetchScalarGridSpec(
            num_scalar_prefetch=0,
            grid=(g_b, g_s),
            in_specs=in_specs,
            out_specs=pl.BlockSpec((1, 1, 128), lambda i, j: (i, 0, j)),
        ),
        compiler_params=pltpu.CompilerParams(
            dimension_semantics=("parallel", "parallel"),
            vmem_limit_bytes=vmem_limit,
        ),
    )(*args)
    return jnp.sum(part), n * s


def _focal_loss_2d(x, target, a, *, gamma, use_alpha, tm=None):
    m, c = x.shape
    t2 = target.reshape(m, 1).astype(jnp.int32)

    itemsize = x.dtype.itemsize
    pad_lane_c = max(128, ((c + 127) // 128) * 128)
    row_bytes = pad_lane_c * itemsize + 128 * 4    # logits row + padded target

    vmem_cap = max(_vmem_capacity_bytes(), 32 << 20)
    tile_target = min(max(vmem_cap // 8, 2 << 20), 8 << 20)

    if tm is None:
        tm_max = max(8, tile_target // row_bytes)
        tm = m if m <= tm_max else max(8, (tm_max // 8) * 8)
    if pl.cdiv(m, tm) < 2 and m > 8:
        # keep >=2 blocks on the parallel axis so both v7x cores are used
        tm = max(8, (((m + 1) // 2 + 7) // 8) * 8)
    g_m = pl.cdiv(m, tm)
    need_mask = (m % tm) != 0

    kernel = functools.partial(
        _focal_rows_kernel, gamma=float(gamma), use_alpha=use_alpha,
        valid_m=m, need_mask=need_mask)

    in_specs = [
        pl.BlockSpec((tm, c), lambda i: (i, 0)),
        pl.BlockSpec((tm, 1), lambda i: (i, 0)),
    ]
    args = [x, t2]
    if use_alpha:
        in_specs.append(pl.BlockSpec((1, c), lambda i: (0, 0)))
        args.append(a.reshape(1, c))

    working = 2 * tm * row_bytes + pad_lane_c * 4 + 2 * 128 * 4
    vmem_limit = int(min(max(working + (4 << 20), 8 << 20),
                         vmem_cap - (4 << 20)))

    part = pl.pallas_call(
        kernel,
        out_shape=jax.ShapeDtypeStruct((1, g_m * 128), jnp.float32),
        grid_spec=pltpu.PrefetchScalarGridSpec(
            num_scalar_prefetch=0,
            grid=(g_m,),
            in_specs=in_specs,
            out_specs=pl.BlockSpec((1, 128), lambda i: (0, i)),
        ),
        compiler_params=pltpu.CompilerParams(
            dimension_semantics=("parallel",),
            vmem_limit_bytes=vmem_limit,
        ),
    )(*args)
    return jnp.sum(part), m


def focal_loss(x, target, *, gamma=0.0, alpha=None, size_average=True,
               ts=None, tm=None):
    """Pallas implementation of FocalLoss.forward.

    x:      float logits, shape (M, C) or (N, C, H, W) (any trailing spatial).
    target: int class indices with one entry per row / spatial position.
    """
    x = jnp.asarray(x)
    target = jnp.asarray(target)
    c = x.shape[1]
    use_alpha = alpha is not None
    a = _alpha_array(alpha, c) if use_alpha else None

    if x.ndim > 2:
        total, count = _focal_loss_nchw(x, target, a, gamma=gamma,
                                        use_alpha=use_alpha, ts=ts)
    else:
        total, count = _focal_loss_2d(x, target, a, gamma=gamma,
                                      use_alpha=use_alpha, tm=tm)
    if size_average:
        return total / jnp.float32(count)
    return total


# ---------------------------------------------------------------------------
# pure-JAX reference (mirrors the PyTorch forward)
# ---------------------------------------------------------------------------


def _reference_focal_loss(x, target, *, gamma, alpha, size_average):
    if x.ndim > 2:
        n, c = x.shape[0], x.shape[1]
        x2 = x.reshape(n, c, -1).transpose(0, 2, 1).reshape(-1, c)
    else:
        x2, c = x, x.shape[1]
    t = target.reshape(-1)
    logp = jax.nn.log_softmax(x2.astype(jnp.float32), axis=1)
    logpt = jnp.take_along_axis(logp, t[:, None], axis=1)[:, 0]
    pt = jnp.exp(logpt)
    if alpha is not None:
        if isinstance(alpha, (float, int)):
            a = jnp.array([float(alpha), 1.0 - float(alpha)], jnp.float32)
        else:
            a = jnp.asarray(alpha, jnp.float32)
        logpt = logpt * a[t]
    loss = -1.0 * (1.0 - pt) ** gamma * logpt
    return loss.mean() if size_average else loss.sum()


if __name__ == "__main__":
    key = jax.random.PRNGKey(0)
    k1, k2, k3, k4 = jax.random.split(key, 4)

    # --- NCHW path: (N, C, H, W), list alpha, integer gamma, mean ---
    N, C, H, W = 2, 4, 16, 16
    x = jax.random.normal(k1, (N, C, H, W), dtype=jnp.float32)
    target = jax.random.randint(k2, (N, H, W), 0, C, dtype=jnp.int32)
    gamma, alpha = 2.0, [0.25, 0.25, 0.25, 0.25]
    loss = jax.block_until_ready(
        focal_loss(x, target, gamma=gamma, alpha=alpha, size_average=True))
    ref = _reference_focal_loss(x, target, gamma=gamma, alpha=alpha,
                                size_average=True)
    if not math.isclose(float(loss), float(ref), rel_tol=1e-5, abs_tol=1e-5):
        raise AssertionError(
            f"NCHW mismatch: pallas={float(loss)} ref={float(ref)}")

    # --- 2D path: (M, C), no alpha, fractional gamma, sum, ragged row tile ---
    M, C2 = 37, 10
    x2 = jax.random.normal(k3, (M, C2), dtype=jnp.float32)
    t2 = jax.random.randint(k4, (M,), 0, C2, dtype=jnp.int32)
    loss2 = jax.block_until_ready(
        focal_loss(x2, t2, gamma=1.5, alpha=None, size_average=False))
    ref2 = _reference_focal_loss(x2, t2, gamma=1.5, alpha=None,
                                 size_average=False)
    if not math.isclose(float(loss2), float(ref2), rel_tol=1e-5, abs_tol=1e-5):
        raise AssertionError(
            f"2D mismatch: pallas={float(loss2)} ref={float(ref2)}")

    print("KERNEL_OK")
</pallas_src>

<mosaic_0001>
module attributes {stable_mosaic.version = 11 : i64} {
  func.func @_focal_nchw_kernel(%arg0: i32, %arg1: i32, %arg2: memref<1x4x256xf32, #tpu.memory_space<vmem>>, %arg3: memref<1x1x256xi32, #tpu.memory_space<vmem>>, %arg4: memref<4x1xf32, #tpu.memory_space<vmem>>, %arg5: memref<1x1x128xf32, #tpu.memory_space<vmem>>) attributes {dimension_semantics = [#tpu.dimension_semantics<parallel>, #tpu.dimension_semantics<parallel>], iteration_bounds = array<i64: 2, 1>, scalar_prefetch = 0 : i64, scratch_operands = 0 : i64, tpu.core_type = #tpu.core_type<tc>, window_params = [{transform_indices = @transform_0, window_bounds = array<i64: 1, 4, 256>}, {transform_indices = @transform_1, window_bounds = array<i64: 1, 1, 256>}, {pipeline_mode = #tpu.pipeline_mode<synchronous>, transform_indices = @transform_2, window_bounds = array<i64: 4, 1>}, {transform_indices = @transform_3, window_bounds = array<i64: 1, 1, 128>}]} {
    %c0 = arith.constant 0 : index
    %c0_0 = arith.constant 0 : index
    %0 = vector.load %arg4[%c0, %c0_0] : memref<4x1xf32, #tpu.memory_space<vmem>>, vector<4x1xf32>
    %1 = tpu.iota {dimensions = array<i32: 2>} : vector<1x1x128xi32>
    %c0_1 = arith.constant 0 : index
    %c0_2 = arith.constant 0 : index
    %c0_3 = arith.constant 0 : index
    %2 = vector.load %arg2[%c0_1, %c0_2, %c0_3] : memref<1x4x256xf32, #tpu.memory_space<vmem>>, vector<1x4x256xf32>
    %3 = vector.shape_cast %2 : vector<1x4x256xf32> to vector<4x256xf32>
    %c0_4 = arith.constant 0 : index
    %c0_5 = arith.constant 0 : index
    %c0_6 = arith.constant 0 : index
    %4 = vector.load %arg3[%c0_4, %c0_5, %c0_6] : memref<1x1x256xi32, #tpu.memory_space<vmem>>, vector<1x1x256xi32>
    %5 = vector.shape_cast %4 : vector<1x1x256xi32> to vector<1x256xi32>
    %cst = arith.constant dense<0xFF800000> : vector<256xf32>
    %6 = vector.multi_reduction <maximumf>, %3, %cst [0] : vector<4x256xf32> to vector<256xf32>
    %7 = vector.shape_cast %6 : vector<256xf32> to vector<1x256xf32>
    %8 = vector.broadcast %7 : vector<1x256xf32> to vector<4x256xf32>
    %9 = arith.subf %3, %8 : vector<4x256xf32>
    %10 = math.exp %9 : vector<4x256xf32>
    %cst_7 = arith.constant dense<0.000000e+00> : vector<256xf32>
    %11 = vector.multi_reduction <add>, %10, %cst_7 [0] : vector<4x256xf32> to vector<256xf32>
    %12 = vector.shape_cast %11 : vector<256xf32> to vector<1x256xf32>
    %13 = math.log %12 : vector<1x256xf32>
    %14 = tpu.iota {dimensions = array<i32: 0>} : vector<4x256xi32>
    %15 = vector.broadcast %5 : vector<1x256xi32> to vector<4x256xi32>
    %16 = arith.cmpi eq, %14, %15 : vector<4x256xi32>
    %17 = arith.extui %16 : vector<4x256xi1> to vector<4x256xi32>
    %18 = arith.sitofp %17 : vector<4x256xi32> to vector<4x256xf32>
    %19 = arith.mulf %9, %18 : vector<4x256xf32>
    %cst_8 = arith.constant dense<0.000000e+00> : vector<256xf32>
    %20 = vector.multi_reduction <add>, %19, %cst_8 [0] : vector<4x256xf32> to vector<256xf32>
    %21 = vector.shape_cast %20 : vector<256xf32> to vector<1x256xf32>
    %22 = arith.subf %21, %13 : vector<1x256xf32>
    %23 = math.exp %22 : vector<1x256xf32>
    %24 = vector.broadcast %0 : vector<4x1xf32> to vector<4x256xf32>
    %25 = arith.mulf %24, %18 : vector<4x256xf32>
    %cst_9 = arith.constant dense<0.000000e+00> : vector<256xf32>
    %26 = vector.multi_reduction <add>, %25, %cst_9 [0] : vector<4x256xf32> to vector<256xf32>
    %27 = vector.shape_cast %26 : vector<256xf32> to vector<1x256xf32>
    %28 = arith.mulf %22, %27 : vector<1x256xf32>
    %cst_10 = arith.constant 1.000000e+00 : f32
    %29 = vector.broadcast %cst_10 : f32 to vector<1x256xf32>
    %30 = arith.subf %29, %23 : vector<1x256xf32>
    %cst_11 = arith.constant 0.000000e+00 : f32
    %31 = vector.broadcast %cst_11 : f32 to vector<1x256xf32>
    %32 = arith.maximumf %30, %31 : vector<1x256xf32>
    %33 = arith.mulf %32, %32 : vector<1x256xf32>
    %cst_12 = arith.constant 0.000000e+00 : f32
    %34 = vector.broadcast %cst_12 : f32 to vector<1x256xf32>
    %35 = arith.subf %34, %33 : vector<1x256xf32>
    %36 = arith.mulf %35, %28 : vector<1x256xf32>
    %37 = vector.shape_cast %36 : vector<1x256xf32> to vector<1x1x256xf32>
    %cst_13 = arith.constant dense<0.000000e+00> : vector<1xf32>
    %38 = vector.multi_reduction <add>, %37, %cst_13 [1, 2] : vector<1x1x256xf32> to vector<1xf32>
    %39 = vector.shape_cast %38 : vector<1xf32> to vector<1x1x1xf32>
    %40 = vector.extract %39[0, 0, 0] : f32 from vector<1x1x1xf32>
    %cst_14 = arith.constant 0.000000e+00 : f32
    %41 = arith.addf %cst_14, %40 : f32
    %c0_i32 = arith.constant 0 : i32
    %42 = vector.broadcast %c0_i32 : i32 to vector<1x1x128xi32>
    %43 = arith.cmpi eq, %1, %42 : vector<1x1x128xi32>
    %cst_15 = arith.constant 0.000000e+00 : f32
    %44 = vector.broadcast %41 : f32 to vector<1x1x128xf32>
    %45 = vector.broadcast %cst_15 : f32 to vector<1x1x128xf32>
    %46 = arith.select %43, %44, %45 : vector<1x1x128xi1>, vector<1x1x128xf32>
    %c0_16 = arith.constant 0 : index
    %c0_17 = arith.constant 0 : index
    %c0_18 = arith.constant 0 : index
    %47 = vector.load %arg5[%c0_16, %c0_17, %c0_18] : memref<1x1x128xf32, #tpu.memory_space<vmem>>, vector<1x1x128xf32>
    tpu.vector_store %arg5[%c0_16, %c0_17, %c0_18], %46 {strides = array<i32>} : memref<1x1x128xf32, #tpu.memory_space<vmem>>, vector<1x1x128xf32>,
    return
  }
  func.func @transform_0(%arg0: i32, %arg1: i32) -> (i32, i32, i32) {
    %c0_i32 = arith.constant 0 : i32
    %c0_i32_0 = arith.constant 0 : i32
    return %arg0, %c0_i32, %arg1 : i32, i32, i32
  }
  func.func @transform_1(%arg0: i32, %arg1: i32) -> (i32, i32, i32) {
    %c0_i32 = arith.constant 0 : i32
    %c0_i32_0 = arith.constant 0 : i32
    return %arg0, %c0_i32, %arg1 : i32, i32, i32
  }
  func.func @transform_2(%arg0: i32, %arg1: i32) -> (i32, i32) {
    %c0_i32 = arith.constant 0 : i32
    %c0_i32_0 = arith.constant 0 : i32
    %c0_i32_1 = arith.constant 0 : i32
    return %c0_i32, %c0_i32_0 : i32, i32
  }
  func.func @transform_3(%arg0: i32, %arg1: i32) -> (i32, i32, i32) {
    %c0_i32 = arith.constant 0 : i32
    %c0_i32_0 = arith.constant 0 : i32
    return %arg0, %c0_i32, %arg1 : i32, i32, i32
  }
}

</mosaic_0001>

<bundles_post_ra>
// kernel: tpu_custom_call.1
= control target key start
LH: loop header
LB: loop body
LE: loop exit
PB: predicated region body
PF: predicated region fallthrough
CT: control target
= control target key end

     0   :  { %8 = vsyncpa [#allocation3], 0  ;;  %s914_s0 = inlined_call_operand.hbm [shape: f32[2,4,256], index: 0, kind: input, shape index: {}]   ;;  %s915_s1 = inlined_call_operand.vmem [shape: s32[2,1,256], index: 1, kind: input, shape index: {}]   ;;  %s916_s2 = inlined_call_operand.vmem [shape: f32[4,1], index: 2, kind: input, shape index: {}]   ;;  %s917_s3 = inlined_call_operand.hbm [shape: f32[2,1,128], index: 3, kind: output, shape index: {}]  }
   0x1   :  { %10 = vsyncpa [#allocation3 + $0x1], 0 }
   0x2   :  { %11 = vsyncpa [#allocation4], 0 }
   0x3   :  { %13 = vsyncpa [#allocation4 + $0x1], 0  ;;  %s723_s12 = smov 0   ;;  %s725_s13 = smov 0  }
   0x4   :  { %s727_s14 = smov 0   ;;  %s729_s15 = smov 0  }
   0x5   :  { %s731_s16 = smov 0   ;;  %s733_s17 = smov 0  }
   0x6 LB: > { %s491_s18 = sadd.s32 4294967295, %s697_s17   ;;  %s492_s19 = sadd.s32 4294967294, %s697_s17   ;;  %s697_s17 = sphi %s733_s17, %s19_s17   ;;  %s693_s16 = sphi %s731_s16, %s933_s16   ;;  %s689_s15 = sphi %s729_s15, %s932_s15   ;;  %s685_s14 = sphi %s727_s14, %s931_s14   ;;  %s681_s13 = sphi %s725_s13, %s930_s13   ;;  %s677_s12 = sphi %s723_s12, %s929_s12  }
   0x7   : > { %s31_s20 = sadd.s32 1, %s693_s16  ;;  %s40_s21 = sadd.s32 1, %s685_s14 }
   0x8   : > { %p33_p0 = scmp.ge.s32.totalorder %s31_s20, 2  ;;  %p47_p1 = scmp.ne.s32.totalorder %s685_s14, %s681_s13 }
   0x9   : > { %p48_p2 = scmp.eq.s32.totalorder %s697_s17, 0  ;;  %p53_p3 = scmp.ne.s32.totalorder %s681_s13, %s677_s12 }
   0xa   : > { %s935_s20 = smov (%p33_p0, %s31_s20), 0  ;;  %p54_p5 = scmp.eq.s32.totalorder %s491_s18, 0 }
   0xb   : > { %p764_p4 = por %p48_p2, %p47_p1  ;;  %s35_s23 = ssub.s32 %s693_s16, %s935_s20 }
   0xc   : > { %p128_p6 = scmp.eq.s32.totalorder %s491_s18, 1  ;;  %p38_p7 = scmp.eq.s32.totalorder %s35_s23, 0 }
   0xd   : > { %p770_p8 = por %p54_p5, %p53_p3  ;;  %p134_p10 = scmp.eq.s32.totalorder %s492_s19, 1 }
   0xe   : > { %p774_p9 = por %p128_p6, %p47_p1  ;;  %p521_p13 = scmp.lt.s32.totalorder %s697_s17, 2 }
   0xf   : > { %s779_s26 = scalar_select %p38_p7, %s685_s14, %s40_s21  }
  0x10   : > { %s921_s25 = scalar_select %p774_p9, 1, 0 }
  0x11   : > { %p781_p11 = por %p134_p10, %p53_p3  ;;  %s157_s28 = sand.u32 1, %s685_s14  }
  0x12   : > { %s495_s29 = sshll.u32 %s157_s28, 3  ;;  %s506_s30 = sshll.u32 %s693_s16, 7 }
  0x13   : > { %s922_s27 = scalar_select %p781_p11, 1, 0 }
  0x14   : > { %s792_s6 = scalar_lea.hbm %s914_s0, %s506_s30  ;;  %s161_s7 = scalar_lea.vmem [#allocation2], %s495_s29 }
  0x15   : > { %s171_s8 = sshll.u32 %s161_s7, 4  ;;  %p798_p0 = pnand %p521_p13, %p764_p4  ;;  %s794_s8 = int_to_ptr.vmem [resolvable:$true] %s171_s8 }
  0x16   : > { %s158_s10 = scalar_lea.sflag [#allocation3], %s157_s28  ;;  %s585_s11 = scalar_lea.hbm %s792_s6, 128 }
  0x17   : > { %p586_p3 = scmp.ne.s32.totalorder %s792_s6, %s585_s11  ;;  %p587_p5 = pneg %p798_p0 }
  0x18   : > { %s590_s21 = scalar_lea.hbm %s914_s0, 256  ;;  %p591_p4 = scmp.lt.u32.totalorder %s792_s6, %s914_s0 }
  0x19   : > { %p588_p6 = pnand %p587_p5, %p586_p3  ;;  %p592_p10 = scmp.lt.u32.totalorder %s590_s21, %s585_s11 }
  0x1a   : > { %p594_p12 = scmp.lt.u32.totalorder %s585_s11, %s792_s6 }
  0x1b   : > { %p589_p7 = pneg %p588_p6  ;;  %p593_p13 = por %p592_p10, %p591_p4 }
  0x1d   : > { %p595_p1 = por %p594_p12, %p593_p13 }
  0x1f   : > { %p596_p2 = pnand %p595_p1, %p589_p7 }
  0x21   : > { %599 = shalt.err (!%p596_p2)
}
  0x22   : > { %s600_s28 = scalar_lea.vmem %s794_s8, 128  ;;  %s699_s29 = smov [#allocation2]  }
  0x23   : > { %p601_p3 = scmp.ne.s32.totalorder %s794_s8, %s600_s28  ;;  %s605_s30 = sshll.u32 %s699_s29, 4  ;;  %s606_s30 = int_to_ptr.vmem [resolvable:$false] %s605_s30 }
  0x24   : > { %s607_s4 = scalar_lea.vmem %s606_s30, 256  ;;  %p608_p9 = scmp.lt.s32.totalorder %s794_s8, %s606_s30 }
  0x25   : > { %p603_p6 = pnand %p601_p3, %p587_p5  ;;  %p609_p4 = scmp.lt.s32.totalorder %s607_s4, %s600_s28 }
  0x27   : > { %p604_p11 = pneg %p603_p6  ;;  %p610_p10 = por %p609_p4, %p608_p9 }
  0x29   : > { %p611_p12 = pnand %p610_p10, %p604_p11 }
  0x2b   : > { %614 = shalt.err (!%p611_p12)
}
  0x2c   : > { %516 = dma.hbm_to_vmem [thread:$0]  (!%p798_p0), %s792_s6, 128, %s794_s8, %s158_s10  }
  0x2d   : > { %p924_p1 = scmp.lt.s32.totalorder %s697_s17, 3  ;;  %p925_p2 = scmp.ge.s32.totalorder %s697_s17, 1 }
  0x2f   : > { %p189_p5 = pnand %p925_p2, %p924_p1 }
  0x30   : > { %s834_s5 = sand.u32 (!%p189_p5), 1, %s681_s13  }
  0x31   : > { %192 = sbr.rel (%p189_p5) target bundleno = 429 (0x1ad), region = 32  ;;  %s499_s7 = sshll.u32 (!%p189_p5), %s834_s5, 3 }
  0x32   : > { %s195_s11 = scalar_lea.sflag (!%p189_p5), [#allocation3], %s834_s5  ;;  %s198_s18 = scalar_lea.vmem (!%p189_p5), [#allocation2], %s499_s7 }
  0x38   : > { %668 = dma.done.wait (%p770_p8), %s195_s11, 128  }
  0x39   : > { %670 = vsyncadd (%p770_p8), %s195_s11, 4294967168  ;;  %v700_v0 = vmov 0   ;;  %v238_v1 = vld [vmem:[%s916_s2] sm:$0xf]  ;;  %vm246_vm0 = vcmask 1043456   ;;  %p230_p8 = scmp.lt.s32.totalorder %s689_s15, 1  ;;  %v239_v21 = vlaneseq }
  0x3a   : > { %573 = vset.pattern.permute.xlu0 %v700_v0  ;;  %v241_v2 = vld [vmem:[%s198_s18] sm:$0xff]  ;;  %v701_v32 = vmov 0.0   ;;  %vm366_vm3 = vcmask 1040384   ;;  %s503_s22 = sshll.u32 %s689_s15, 4  ;;  %s227_s23 = scalar_lea.vmem [#allocation5], %s834_s5 }
  0x3b   : > { %335 = vperm.xlu0 %573, %v238_v1   ;;  %v244_v3 = vcombine.high %v241_v2, %v241_v2  ;;  %v247_v4 = vsel %vm246_vm0, %v241_v2, -inf  ;;  %s231_s24 = scalar_select %p230_p8, %s689_s15, 1  ;;  %v290_v22 = vshrl.u32 %v239_v21, 7 }
  0x3c   : > { %v248_v6 = vrot.slane %v247_v4, 4  ;;  %s398_s28 = sshll.u32 %s227_s23, 4  ;;  %s865_s7 = scalar_lea.hbm %s917_s3, %s503_s22  ;;  %s867_s28 = int_to_ptr.vmem [resolvable:$true] %s398_s28 }
  0x3d   : > { %v254_v5 = vsel %vm246_vm0, %v244_v3, -inf  ;;  %s500_s9 = sshll.u32 %s231_s24, 1  ;;  %v293_v23 = vsub.s32 0, %v290_v22  ;;  %v297_v24 = vsub.s32 1, %v290_v22  ;;  %s385_s11 = scalar_lea.sflag [#allocation4], %s834_s5 }
  0x3e   : > { %v255_v7 = vrot.slane %v254_v5, 4  ;;  %v249_v8 = vmax.f32 %v247_v4, %v248_v6  ;;  %s236_s21 = scalar_lea.vmem %s915_s1, %s500_s9  ;;  %s615_s18 = scalar_lea.vmem %s867_s28, 16 }
  0x3f   : > { %v242_v25 = vld [vmem:[%s236_s21] sm:$0x3]  ;;  %p616_p9 = scmp.ne.s32.totalorder %s867_s28, %s615_s18  ;;  %p926_p11 = scmp.ne.s32.totalorder %s921_s25, 0 }
  0x40   : > { %v256_v9 = vmax.f32 %v254_v5, %v255_v7  ;;  %v250_v10 = vrot.slane %v249_v8, 2  ;;  %v294_v27 = vrot.slane %v242_v25, %v293_v23  ;;  %v298_v28 = vrot.slane %v242_v25, %v297_v24  ;;  %s702_s15 = smov [#allocation5]  }
  0x41   : > { %p617_p0 = pnand %p616_p9, %p926_p11  ;;  %s619_s6 = sshll.u32 %s702_s15, 4  ;;  %s620_s6 = int_to_ptr.vmem [resolvable:$false] %s619_s6 }
  0x42   : > { %v257_v11 = vrot.slane %v256_v9, 2  ;;  %v251_v12 = vmax.f32 %v249_v8, %v250_v10  ;;  %vm299_vm1 = vcmp.eq.s32.totalorder %v290_v22, %v294_v27  ;;  %vm300_vm2 = vcmp.eq.s32.totalorder %v290_v22, %v298_v28  ;;  %s621_s8 = scalar_lea.vmem %s620_s6, 32  ;;  %p622_p13 = scmp.lt.s32.totalorder %s867_s28, %s620_s6 }
  0x43   : > { %v501_v33 = vsel %vm299_vm1, 1.0, %v701_v32  ;;  %v502_v34 = vsel %vm300_vm2, 1.0, %v701_v32  ;;  %p618_p7 = pneg %p617_p0  ;;  %p623_p3 = scmp.lt.s32.totalorder %s621_s8, %s615_s18 }
  0x44   : > { %v258_v13 = vmax.f32 %v256_v9, %v257_v11  ;;  %v252_v14 = vrot.slane %v251_v12, 1  ;;  %v307_v37 = vcombine.low %v501_v33, %v502_v34 }
  0x45   : > { %p624_p6 = por %p623_p3, %p622_p13 }
  0x46   : > { %v259_v15 = vrot.slane %v258_v13, 1  ;;  %v253_v16 = vmax.f32 %v251_v12, %v252_v14 }
  0x47   : > { %p625_p4 = pnand %p624_p6, %p618_p7 }
  0x48   : > { %v260_v17 = vmax.f32 %v258_v13, %v259_v15 }
  0x4a   : > { %v263_v18 = vcombine.low %v253_v16, %v260_v17 }
  0x4c   : > { %v265_v19 = vsub.f32 %v241_v2, %v263_v18 }
  0x4e   : > { %v266_v20 = vmul.f32 1.442695, %v265_v19  ;;  %v309_v40 = vmul.f32 %v307_v37, %v265_v19 }
  0x50   : > { %575 = vpow2.f32 %v266_v20  ;;  %v311_v43 = vcombine.high %v309_v40, %v309_v40  ;;  %v313_v46 = vsel %vm246_vm0, %v309_v40, 0.0 }
  0x51   : > { %v314_v49 = vrot.slane %v313_v46, 4 }
  0x52   : > { %v320_v47 = vsel %vm246_vm0, %v311_v43, 0.0 }
  0x53   : > { %v321_v51 = vrot.slane %v320_v47, 4  ;;  %v315_v53 = vadd.f32 %v314_v49, %v313_v46 }
  0x55   : > { %v322_v55 = vadd.f32 %v321_v51, %v320_v47  ;;  %v316_v56 = vrot.slane %v315_v53, 2 }
  0x57   : > { %v323_v57 = vrot.slane %v322_v55, 2  ;;  %v317_v58 = vadd.f32 %v316_v56, %v315_v53 }
  0x59   : > { %v324_v59 = vadd.f32 %v323_v57, %v322_v55  ;;  %v318_v60 = vrot.slane %v317_v58, 1 }
  0x5a   : > { %v576_v26 = vpop.eup %575 }
  0x5b   : > { %v269_v29 = vcombine.high %v576_v26, %v576_v26  ;;  %v271_v30 = vsel %vm246_vm0, %v576_v26, 0.0  ;;  %v325_v62 = vrot.slane %v324_v59, 1  ;;  %v319_v1 = vadd.f32 %v318_v60, %v317_v58 }
  0x5c   : > { %v272_v35 = vrot.slane %v271_v30, 4 }
  0x5d   : > { %v278_v31 = vsel %vm246_vm0, %v269_v29, 0.0  ;;  %v326_v3 = vadd.f32 %v325_v62, %v324_v59 }
  0x5e   : > { %v279_v36 = vrot.slane %v278_v31, 4  ;;  %v273_v38 = vadd.f32 %v272_v35, %v271_v30 }
  0x60   : > { %v280_v39 = vadd.f32 %v279_v36, %v278_v31  ;;  %v274_v41 = vrot.slane %v273_v38, 2 }
  0x62   : > { %v281_v42 = vrot.slane %v280_v39, 2  ;;  %v275_v44 = vadd.f32 %v274_v41, %v273_v38 }
  0x64   : > { %v282_v45 = vadd.f32 %v281_v42, %v280_v39  ;;  %v276_v48 = vrot.slane %v275_v44, 1 }
  0x66   : > { %v283_v50 = vrot.slane %v282_v45, 1  ;;  %v277_v52 = vadd.f32 %v276_v48, %v275_v44 }
  0x68   : > { %v284_v54 = vadd.f32 %v283_v50, %v282_v45  ;;  %577 = vlog2.f32 %v277_v52  ;;  %v240_v50 = vand.u32 127, %v239_v21 }
  0x6a   : > { %579 = vlog2.f32 %v284_v54  ;;  %vm380_vm4 = vcmp.eq.s32.totalorder %v240_v50, 0 }
  0x72   : > { %v578_v61 = vpop.eup %577 }
  0x73   : > { %v286_v0 = vmul.f32 0.6931472, %v578_v61 }
  0x74   : > { %v580_v63 = vpop.eup %579 }
  0x75   : > { %v288_v2 = vmul.f32 0.6931472, %v580_v63  ;;  %v327_v4 = vsub.f32 %v319_v1, %v286_v0 }
  0x77   : > { %v328_v5 = vsub.f32 %v326_v3, %v288_v2  ;;  %v329_v6 = vmul.f32 1.442695, %v327_v4 }
  0x79   : > { %v331_v7 = vmul.f32 1.442695, %v328_v5  ;;  %581 = vpow2.f32 %v329_v6 }
  0x7b   : > { %583 = vpow2.f32 %v331_v7 }
  0x83   : > { %v582_v8 = vpop.eup %581 }
  0x84   : > { %v356_v13 = vsub.f32 1.0, %v582_v8 }
  0x85   : > { %v584_v9 = vpop.eup %583 }
  0x86   : > { %v357_v14 = vsub.f32 1.0, %v584_v9  ;;  %v358_v22 = vmax.f32 %v356_v13, 0.0 }
  0x88   : > { %v359_v23 = vmax.f32 %v357_v14, 0.0  ;;  %v360_v28 = vmul.f32 %v358_v22, %v358_v22 }
  0x8a   : > { %v361_v29 = vmul.f32 %v359_v23, %v359_v23 }
  0x8c   : > { %v363_v35 = vsub.f32 0.0, %v361_v29 }
  0xba   : > { %v336_v10 = vpop.permute.xlu0 %335 }
  0xbb   : > { %v338_v11 = vmul.f32 %v501_v33, %v336_v10  ;;  %v339_v12 = vmul.f32 %v502_v34, %v336_v10  ;;  %v362_v34 = vsub.f32 0.0, %v360_v28 }
  0xbd   : > { %v340_v15 = vsel %vm246_vm0, %v338_v11, 0.0  ;;  %v347_v16 = vsel %vm246_vm0, %v339_v12, 0.0 }
  0xbe   : > { %v341_v17 = vrot.slane %v340_v15, 4  ;;  %v348_v18 = vrot.slane %v347_v16, 4 }
  0xc0   : > { %v342_v19 = vadd.f32 %v341_v17, %v340_v15  ;;  %v349_v20 = vadd.f32 %v348_v18, %v347_v16 }
  0xc2   : > { %v343_v24 = vrot.slane %v342_v19, 2  ;;  %v350_v25 = vrot.slane %v349_v20, 2 }
  0xc4   : > { %v344_v26 = vadd.f32 %v343_v24, %v342_v19  ;;  %v351_v27 = vadd.f32 %v350_v25, %v349_v20 }
  0xc6   : > { %v345_v30 = vrot.slane %v344_v26, 1  ;;  %v352_v31 = vrot.slane %v351_v27, 1 }
  0xc8   : > { %v346_v32 = vadd.f32 %v345_v30, %v344_v26  ;;  %v353_v33 = vadd.f32 %v352_v31, %v351_v27 }
  0xca   : > { %v354_v36 = vmul.f32 %v346_v32, %v327_v4  ;;  %v355_v37 = vmul.f32 %v353_v33, %v328_v5 }
  0xcc   : > { %v364_v38 = vmul.f32 %v362_v34, %v354_v36  ;;  %v365_v39 = vmul.f32 %v363_v35, %v355_v37 }
  0xce   : > { %v367_v40 = vsel %vm366_vm3, %v364_v38, 0.0  ;;  %v368_v41 = vsel %vm366_vm3, %v365_v39, 0.0 }
  0xcf   : > { %v369_v42 = vadd.f32 %v368_v41, %v367_v40 }
  0xd1   : > { %370 = vadd.xlane.f32.xlu0 %v369_v42 }
 0x15e   : > { %v371_v43 = vpop.xlane.xlu0 %370 }
 0x15f   : > { %v372_v44 = vrot.slane %v371_v43, 4 }
 0x161   : > { %v373_v45 = vadd.f32 %v372_v44, %v371_v43 }
 0x163   : > { %v374_v46 = vrot.slane %v373_v45, 2 }
 0x165   : > { %v375_v47 = vadd.f32 %v374_v46, %v373_v45 }
 0x167   : > { %v376_v48 = vrot.slane %v375_v47, 1 }
 0x169   : > { %v377_v49 = vadd.f32 %v376_v48, %v375_v47 }
 0x16b   : > { %507 = vpush %v377_v49 }
 0x19c   : > { %s508_s29 = spop %507 }
 0x19d   : > { %v381_v51 = vstv %s508_s29 }
 0x19e   : > { %v382_v52 = vsel %vm380_vm4, %v381_v51, 0.0 }
 0x19f   : > { %383 = vst [vmem:[%s227_s23] sm:$0x1] %v382_v52 }
 0x1a0   : > { %628 = shalt.err (!%p625_p4)
}
 0x1a1   : > { %s629_s5 = scalar_lea.hbm %s865_s7, 16  ;;  %s633_s10 = scalar_lea.hbm %s917_s3, 32 }
 0x1a2   : > { %p630_p10 = scmp.ne.s32.totalorder %s865_s7, %s629_s5  ;;  %p634_p2 = scmp.lt.u32.totalorder %s865_s7, %s917_s3 }
 0x1a3   : > { %p635_p5 = scmp.lt.u32.totalorder %s633_s10, %s629_s5  ;;  %p637_p9 = scmp.lt.u32.totalorder %s629_s5, %s865_s7 }
 0x1a4   : > { %p631_p12 = pnand %p630_p10, %p926_p11 }
 0x1a5   : > { %p636_p8 = por %p635_p5, %p634_p2 }
 0x1a6   : > { %p632_p1 = pneg %p631_p12 }
 0x1a7   : > { %p638_p0 = por %p637_p9, %p636_p8 }
 0x1a9   : > { %p639_p7 = pnand %p638_p0, %p632_p1 }
 0x1ab   : > { %642 = shalt.err (!%p639_p7)
}
 0x1ac   : > { %511 = dma.vmem_to_hbm [thread:$0]  (%p926_p11), %s867_s28, 16, %s865_s7, %s385_s11  }
 0x1ad PF: > { %s410_s22 = sand.u32 1, %s677_s12   ;;  %p927_p13 = scmp.ne.s32.totalorder %s922_s27, 0 }
 0x1ae   : > { %p928_p3 = scmp.ge.s32.totalorder %s697_s17, 2  ;;  %s411_s23 = scalar_lea.sflag [#allocation4], %s410_s22 }
 0x1b0   : > { %p518_p6 = pnand %p928_p3, %p927_p13 }
 0x1b2   : > { %672 = dma.done.wait (!%p518_p6), %s411_s23, 16  }
 0x1b3   : > { %674 = vsyncadd (!%p518_p6), %s411_s23, 4294967280  ;;  %s19_s17 = sadd.s32 1, %s697_s17   ;;  %s929_s12 = smov %s681_s13 }
 0x1b4   : > { %p16_p4 = scmp.ge.s32.totalorder %s19_s17, 4   ;;  %s930_s13 = smov %s685_s14 }
 0x1b5   : > { %s931_s14 = smov %s779_s26  ;;  %s932_s15 = smov %s693_s16 }
 0x1b6   : > { %s933_s16 = smov %s935_s20  ;;  %18 = sbr.rel (!%p16_p4) target bundleno = 6 (0x6), region = 80 }
 0x1bd   :  { %415 = vsyncpa [#allocation3], 1 }
 0x1be   :  { %417 = vsyncpa [#allocation3 + $0x1], 1 }
 0x1bf   :  { %418 = vsyncpa [#allocation4], 1 }
 0x1c0   :  { %420 = vsyncpa [#allocation4 + $0x1], 1 }

</bundles_post_ra>
